<compile_context>
chip_gen: v5e
topology: v5e:2x2
jax: 0.10.0
libtpu: 0.0.40
codegen_flags: <defaults>
</compile_context>

<pallas_src>
import math
import functools

import jax
import jax.numpy as jnp
from jax.experimental import pallas as pl
from jax.experimental.pallas import tpu as pltpu

_WIDTHS = (1024, 512, 256, 128)   # candidate lane-dense slab widths (mult. of 128)


def _round_up(x, m):
    return ((x + m - 1) // m) * m


def _pick_target_block_bytes():
    """~2 MiB tiles on v5e/v6e; ~4 MiB on v7x (amortizes per-grid-step cost
    at 3.2 TB/s while 4 double-buffered tiles still fit 32 MiB scoped VMEM)."""
    try:
        kind = jax.devices()[0].device_kind.lower()
    except Exception:
        return 2 * 1024 * 1024
    if "v7" in kind:
        return 4 * 1024 * 1024
    return 2 * 1024 * 1024


def _cosine_cutoff_kernel(d_ref, o_ref, *, scale, bias, lower, upper, use_lower):
    d = d_ref[...]
    # Compute in the input dtype to match the reference's (weak-typed) behavior.
    arg = d * jnp.asarray(scale, d.dtype) + jnp.asarray(bias, d.dtype)
    cut = 0.5 * jnp.cos(arg) + 0.5
    if use_lower:
        mask = (d < upper) & (d > lower)
    else:
        mask = d < upper
    o_ref[...] = jnp.where(mask, cut, 0.0).astype(o_ref.dtype)


def cosine_cutoff(distances, cutoff_lower=0.0, cutoff_upper=5.0):
    """Apply the cosine cutoff elementwise via a Pallas TPU kernel.

    Accepts any shape. If the flattened size divides by a lane width
    (1024/512/256/128) the array is fed to the kernel via a metadata-only
    reshape (no pad / no crop); otherwise it is padded up to one slab row.
    """
    orig_shape = distances.shape
    dtype = distances.dtype
    itemsize = jnp.dtype(dtype).itemsize
    n = int(distances.size)

    if n == 0:
        return jnp.zeros(orig_shape, dtype)

    lower = float(cutoff_lower)
    upper = float(cutoff_upper)
    use_lower = lower > 0.0
    if use_lower:
        scale = 2.0 * math.pi / (upper - lower)
        bias = math.pi * (1.0 - 2.0 * lower / (upper - lower))
    else:
        scale = math.pi / upper
        bias = 0.0

    # ---- Layout: view the (flattened) input as a lane-dense [rows, width] slab.
    width = next((w for w in _WIDTHS if n % w == 0), None)
    if width is not None:
        # Fast path: metadata-only reshape, no pad, no output crop.
        rows = n // width
        slab = distances.reshape(rows, width)
        cropped = False
    else:
        # Ragged size: pad the flat vector up to a whole slab row (< width elems).
        width = _WIDTHS[0]
        rows = pl.cdiv(n, width)
        flat = distances.reshape(-1)
        flat = jnp.pad(flat, (0, rows * width - n))
        slab = flat.reshape(rows, width)
        cropped = True

    # ---- Tiling over rows; partial last block is handled by Pallas (writes drop).
    sm = 8 * max(1, 4 // itemsize)              # sublane multiple: 8 f32 / 16 bf16
    target_rows = _round_up(
        max(sm, _pick_target_block_bytes() // (itemsize * width)), sm)
    rows_rounded = _round_up(rows, sm)

    if rows <= 2 * sm:
        block_rows = rows                        # tiny: one full-extent block
    elif rows_rounded <= 2 * target_rows:
        # small/mid: split in two so v7x can shard across both TensorCores
        block_rows = _round_up(pl.cdiv(rows, 2), sm)
    else:
        block_rows = target_rows
    grid_rows = pl.cdiv(rows, block_rows)

    kernel = functools.partial(
        _cosine_cutoff_kernel,
        scale=scale, bias=bias, lower=lower, upper=upper, use_lower=use_lower,
    )

    total = rows * width
    cost = pl.CostEstimate(
        flops=4 * total,
        transcendentals=total,
        bytes_accessed=2 * total * itemsize,
    )

    out = pl.pallas_call(
        kernel,
        out_shape=jax.ShapeDtypeStruct((rows, width), dtype),
        grid=(grid_rows,),
        in_specs=[pl.BlockSpec((block_rows, width), lambda i: (i, 0))],
        out_specs=pl.BlockSpec((block_rows, width), lambda i: (i, 0)),
        compiler_params=pltpu.CompilerParams(
            dimension_semantics=("parallel",),
        ),
        cost_estimate=cost,
    )(slab)

    if cropped:
        return out.reshape(-1)[:n].reshape(orig_shape)
    return out.reshape(orig_shape)


def _reference(distances, cutoff_lower=0.0, cutoff_upper=5.0):
    d = distances
    if cutoff_lower > 0:
        c = 0.5 * (jnp.cos(math.pi * (2 * (d - cutoff_lower) / (cutoff_upper - cutoff_lower) + 1.0)) + 1.0)
        c = c * (d < cutoff_upper).astype(d.dtype)
        c = c * (d > cutoff_lower).astype(d.dtype)
        return c
    c = 0.5 * (jnp.cos(d * math.pi / cutoff_upper) + 1.0)
    return c * (d < cutoff_upper).astype(d.dtype)


if __name__ == "__main__":
    key = jax.random.PRNGKey(0)
    k1, k2, k3, k4 = jax.random.split(key, 4)

    # Case 1: small edge-distance tensor, fast path (n % 1024 == 0), single block.
    d1 = jax.random.uniform(k1, (32, 128), dtype=jnp.float32) * 8.0
    out1 = jax.block_until_ready(cosine_cutoff(d1, 0.0, 5.0))
    ref1 = _reference(d1, 0.0, 5.0)
    assert jnp.allclose(out1, ref1, atol=1e-6, rtol=1e-6), "mismatch (lower=0, small)"

    # Case 2: nonzero lower cutoff, ragged size (exercises pad + crop path).
    d2 = jax.random.uniform(k2, (7, 33), dtype=jnp.float32) * 8.0
    out2 = jax.block_until_ready(cosine_cutoff(d2, 1.0, 5.0))
    ref2 = _reference(d2, 1.0, 5.0)
    assert jnp.allclose(out2, ref2, atol=1e-6, rtol=1e-6), "mismatch (lower>0, ragged)"

    # Case 3: mid-size tensor, fast path split into 2 parallel grid steps.
    d3 = jax.random.uniform(k3, (2048, 512), dtype=jnp.float32) * 8.0
    out3 = jax.block_until_ready(cosine_cutoff(d3, 0.0, 5.0))
    ref3 = _reference(d3, 0.0, 5.0)
    assert jnp.allclose(out3, ref3, atol=1e-6, rtol=1e-6), "mismatch (lower=0, 2-block)"

    # Case 4: rows not a multiple of the block -> partial last block (no row pad).
    d4 = jax.random.uniform(k4, (1300, 1024), dtype=jnp.float32) * 8.0
    out4 = jax.block_until_ready(cosine_cutoff(d4, 0.0, 5.0))
    ref4 = _reference(d4, 0.0, 5.0)
    assert jnp.allclose(out4, ref4, atol=1e-6, rtol=1e-6), "mismatch (partial block)"

    print("KERNEL_OK")
</pallas_src>

<mosaic_0001>
module attributes {stable_mosaic.version = 11 : i64} {
  func.func @_cosine_cutoff_kernel(%arg0: i32, %arg1: memref<4x1024xf32, #tpu.memory_space<vmem>>, %arg2: memref<4x1024xf32, #tpu.memory_space<vmem>>) attributes {dimension_semantics = [#tpu.dimension_semantics<parallel>], iteration_bounds = array<i64: 1>, scalar_prefetch = 0 : i64, scratch_operands = 0 : i64, tpu.core_type = #tpu.core_type<tc>, window_params = [{transform_indices = @transform_0, window_bounds = array<i64: 4, 1024>}, {transform_indices = @transform_1, window_bounds = array<i64: 4, 1024>}]} {
    %c0 = arith.constant 0 : index
    %c0_0 = arith.constant 0 : index
    %0 = vector.load %arg1[%c0, %c0_0] : memref<4x1024xf32, #tpu.memory_space<vmem>>, vector<4x1024xf32>
    %cst = arith.constant 0.628318548 : f32
    %1 = vector.broadcast %cst : f32 to vector<4x1024xf32>
    %2 = arith.mulf %0, %1 : vector<4x1024xf32>
    %cst_1 = arith.constant 0.000000e+00 : f32
    %3 = vector.broadcast %cst_1 : f32 to vector<4x1024xf32>
    %4 = arith.addf %2, %3 : vector<4x1024xf32>
    %5 = math.cos %4 : vector<4x1024xf32>
    %cst_2 = arith.constant 5.000000e-01 : f32
    %6 = vector.broadcast %cst_2 : f32 to vector<4x1024xf32>
    %7 = arith.mulf %6, %5 : vector<4x1024xf32>
    %cst_3 = arith.constant 5.000000e-01 : f32
    %8 = vector.broadcast %cst_3 : f32 to vector<4x1024xf32>
    %9 = arith.addf %7, %8 : vector<4x1024xf32>
    %cst_4 = arith.constant 5.000000e+00 : f32
    %10 = vector.broadcast %cst_4 : f32 to vector<4x1024xf32>
    %11 = arith.cmpf olt, %0, %10 : vector<4x1024xf32>
    %cst_5 = arith.constant 0.000000e+00 : f32
    %12 = vector.broadcast %cst_5 : f32 to vector<4x1024xf32>
    %13 = arith.select %11, %9, %12 : vector<4x1024xi1>, vector<4x1024xf32>
    %c0_6 = arith.constant 0 : index
    %c0_7 = arith.constant 0 : index
    %14 = vector.load %arg2[%c0_6, %c0_7] : memref<4x1024xf32, #tpu.memory_space<vmem>>, vector<4x1024xf32>
    tpu.vector_store %arg2[%c0_6, %c0_7], %13 {strides = array<i32>} : memref<4x1024xf32, #tpu.memory_space<vmem>>, vector<4x1024xf32>,
    return
  }
  func.func @transform_0(%arg0: i32) -> (i32, i32) {
    %c0_i32 = arith.constant 0 : i32
    %c0_i32_0 = arith.constant 0 : i32
    return %arg0, %c0_i32 : i32, i32
  }
  func.func @transform_1(%arg0: i32) -> (i32, i32) {
    %c0_i32 = arith.constant 0 : i32
    %c0_i32_0 = arith.constant 0 : i32
    return %arg0, %c0_i32 : i32, i32
  }
}

</mosaic_0001>

<bundles_post_ra>
// kernel: tpu_custom_call.1
= control target key start
LH: loop header
LB: loop body
LE: loop exit
PB: predicated region body
PF: predicated region fallthrough
CT: control target
= control target key end

     0   :  { %6 = vsyncpa [#allocation3], 0  ;;  %s1228_s0 = inlined_call_operand.hbm [shape: f32[4,1024], index: 0, kind: input, shape index: {}]   ;;  %s1229_s1 = inlined_call_operand.hbm [shape: f32[4,1024], index: 1, kind: output, shape index: {}]  }
   0x1   :  { %7 = vsyncpa [#allocation4], 0  ;;  %s13_s8 = sshll.u32 %s1228_s0, 4  ;;  %s764_s9 = smov [#allocation2]   ;;  %s14_s8 = int_to_ptr.hbm [resolvable:$true] %s13_s8 }
   0x2   :  { %s15_s10 = sshll.u32 %s764_s9, 4  ;;  %s16_s10 = int_to_ptr.vmem [resolvable:$true] %s15_s10 }
   0x3   :  { %18 = dma.hbm_to_vmem [thread:$0]  %s14_s8, 512, %s16_s10, [#allocation3]  }
   0x4   :  { %760 = dma.done.wait [#allocation3], 512  }
   0x5   :  { %761 = vsyncadd [#allocation3], 4294966784  ;;  %v23_v0 = vld [vmem:[#allocation2] sm:$0xff]  ;;  %v24_v1 = vld [vmem:[#allocation2 + $0x8] sm:$0xff]  ;;  %v765_v31 = vmov 683565275  }
   0x6   :  { %v25_v2 = vld [vmem:[#allocation2 + $0x10] sm:$0xff]  ;;  %v786_v3 = vmul.f32 0.62831855, %v23_v0  ;;  %v788_v4 = vmul.f32 0.62831855, %v24_v1  ;;  %s772_s0 = smov [#allocation5]  }
   0x7   :  { %v790_v5 = vmul.f32 0.62831855, %v25_v2  ;;  %v766_v33 = vmov 2475754826   ;;  %v767_v35 = vmov 2131351028  }
   0x8   :  { %v35_v6 = vand.u32 2147483647, %v786_v3  ;;  %v38_v7 = vand.u32 2139095040, %v786_v3  ;;  %v189_v8 = vand.u32 2147483647, %v788_v4  ;;  %v192_v9 = vand.u32 2139095040, %v788_v4 }
   0x9   :  { %v346_v10 = vand.u32 2139095040, %v790_v5  ;;  %v768_v37 = vmov 2102212464   ;;  %v769_v39 = vmov 920167782   ;;  %s676_s11 = sshll.u32 %s772_s0, 4  ;;  %s677_s11 = int_to_ptr.vmem [resolvable:$true] %s676_s11 }
   0xa   :  { %v39_v11 = vshrl.u32 %v38_v7, 23  ;;  %v42_v12 = vand.u32 8388607, %v35_v6  ;;  %v193_v13 = vshrl.u32 %v192_v9, 23  ;;  %v196_v14 = vand.u32 8388607, %v189_v8 }
   0xb   :  { %v347_v18 = vshrl.u32 %v346_v10, 23  ;;  %v770_v48 = vmov 1326507024   ;;  %s678_s14 = sshll.u32 %s1229_s1, 4  ;;  %s679_s14 = int_to_ptr.hbm [resolvable:$true] %s678_s14 }
   0xc   :  { %v688_v15 = vadd.s32 4294967169, %v39_v11  ;;  %v43_v16 = vor.u32 8388608, %v42_v12  ;;  %v691_v17 = vadd.s32 4294967169, %v193_v13  ;;  %v197_v20 = vor.u32 8388608, %v196_v14 }
   0xd   :  { %v694_v24 = vadd.s32 4294967169, %v347_v18 }
   0xe   :  { %v45_v19 = vadd.s32 1, %v688_v15  ;;  %v199_v21 = vadd.s32 1, %v691_v17  ;;  %v801_v23 = vshll.u32 %v43_v16, 8  ;;  %v807_v29 = vshll.u32 %v197_v20, 8 }
   0xf   :  { %v815_v42 = vadd.s32 1, %v694_v24 }
  0x10   :  { %vm46_vm0 = vcmp.gt.s32.totalorder %v45_v19, 0  ;;  %vm200_vm1 = vcmp.gt.s32.totalorder %v199_v21, 0  ;;  %v84_v41 = vand.u32 65535, %v801_v23  ;;  %v85_v46 = vshrl.u32 %v801_v23, 16 }
  0x11   :  { %v47_v22 = vsel %vm46_vm0, %v45_v19, 0  ;;  %v201_v26 = vsel %vm200_vm1, %v199_v21, 0  ;;  %vm354_vm15 = vcmp.gt.s32.totalorder %v815_v42, 0 }
  0x12   :  { %v49_v25 = vand.u32 31, %v47_v22  ;;  %v803_v27 = vshrl.u32 %v47_v22, 5  ;;  %v805_v28 = vand.u32 31, %v201_v26  ;;  %v835_v59 = vshrl.u32 %v201_v26, 5 }
  0x14   :  { %v50_v30 = vsub.s32 32, %v49_v25  ;;  %v52_v32 = vshll.u32 %v765_v31, %v49_v25  ;;  %v55_v34 = vshll.u32 %v766_v33, %v49_v25  ;;  %v58_v36 = vshll.u32 %v767_v35, %v49_v25 }
  0x15   :  { %v61_v38 = vshll.u32 %v768_v37, %v49_v25  ;;  %v64_v40 = vshll.u32 %v769_v39, %v49_v25  ;;  %vm67_vm2 = vcmp.lt.s32.totalorder %v803_v27, 1  ;;  %vm70_vm3 = vcmp.lt.s32.totalorder %v803_v27, 4 }
  0x16   :  { %v53_v43 = vshrl.u32 %v766_v33, %v50_v30  ;;  %v56_v44 = vshrl.u32 %v767_v35, %v50_v30  ;;  %v59_v45 = vshrl.u32 %v768_v37, %v50_v30  ;;  %v62_v47 = vshrl.u32 %v769_v39, %v50_v30 }
  0x17   :  { %v65_v49 = vshrl.u32 %v770_v48, %v50_v30  ;;  %v826_v53 = vsub.s32 32, %v805_v28  ;;  %v51_v54 = vshrl.u32 %v765_v31, %v50_v30  ;;  %vm69_vm4 = vcmp.lt.s32.totalorder %v803_v27, 3 }
  0x18   :  { %v54_v50 = vor.u32 %v53_v43, %v52_v32  ;;  %v57_v51 = vor.u32 %v56_v44, %v55_v34  ;;  %v60_v52 = vor.u32 %v59_v45, %v58_v36  ;;  %v63_v55 = vor.u32 %v62_v47, %v61_v38 }
  0x19   :  { %v66_v56 = vor.u32 %v65_v49, %v64_v40  ;;  %vm68_vm5 = vcmp.lt.s32.totalorder %v803_v27, 2  ;;  %v206_v62 = vshll.u32 %v765_v31, %v805_v28  ;;  %v209_v63 = vshll.u32 %v766_v33, %v805_v28 }
  0x1a   :  { %v75_v57 = vsel %vm67_vm2, %v54_v50, %v57_v51  ;;  %v79_v58 = vsel %vm67_vm2, %v57_v51, %v60_v52  ;;  %v76_v60 = vsel %vm70_vm3, %v63_v55, 920167782  ;;  %v72_v0 = vsel %vm70_vm3, %v60_v52, 2102212464 }
  0x1b   :  { %v80_v61 = vsel %vm70_vm3, %v66_v56, 1326507024  ;;  %v77_v1 = vsel %vm69_vm4, %v60_v52, %v76_v60  ;;  %v207_v7 = vshrl.u32 %v766_v33, %v826_v53  ;;  %v71_v9 = vsel %vm67_vm2, %v51_v54, %v54_v50 }
  0x1c   :  { %v81_v2 = vsel %vm69_vm4, %v63_v55, %v80_v61  ;;  %v78_v10 = vsel %vm68_vm5, %v75_v57, %v77_v1  ;;  %v210_v12 = vshrl.u32 %v767_v35, %v826_v53  ;;  %v73_v17 = vsel %vm69_vm4, %v57_v51, %v72_v0 }
  0x1d   :  { %v82_v11 = vsel %vm68_vm5, %v79_v58, %v81_v2  ;;  %v108_v15 = vand.u32 65535, %v78_v10  ;;  %v109_v16 = vshrl.u32 %v78_v10, 16  ;;  %v863_v18 = vor.u32 %v207_v7, %v206_v62 }
  0x1e   :  { %v86_v13 = vand.u32 65535, %v82_v11  ;;  %v87_v14 = vshrl.u32 %v82_v11, 16  ;;  %v865_v19 = vor.u32 %v210_v12, %v209_v63  ;;  %v212_v20 = vshll.u32 %v767_v35, %v805_v28 }
  0x1f   :  { %v213_v25 = vshrl.u32 %v768_v37, %v826_v53  ;;  %v110_v30 = vmul.u32 %v108_v15, %v84_v41  ;;  %v111_v32 = vmul.u32 %v109_v16, %v84_v41  ;;  %v112_v34 = vmul.u32 %v108_v15, %v85_v46 }
  0x20   :  { %v88_v21 = vmul.u32 %v86_v13, %v84_v41  ;;  %v89_v22 = vmul.u32 %v87_v14, %v84_v41  ;;  %v90_v24 = vmul.u32 %v86_v13, %v85_v46  ;;  %v91_v26 = vmul.u32 %v87_v14, %v85_v46 }
  0x21   :  { %v113_v43 = vmul.u32 %v109_v16, %v85_v46  ;;  %v114_v45 = vshll.u32 %v111_v32, 16  ;;  %v115_v47 = vshrl.u32 %v111_v32, 16  ;;  %v116_v49 = vshll.u32 %v112_v34, 16 }
  0x22   :  { %v92_v36 = vshll.u32 %v89_v22, 16  ;;  %v93_v38 = vshrl.u32 %v89_v22, 16  ;;  %v94_v40 = vshll.u32 %v90_v24, 16  ;;  %v95_v44 = vshrl.u32 %v90_v24, 16 }
  0x23   :  { %v117_v51 = vshrl.u32 %v112_v34, 16  ;;  %v215_v52 = vshll.u32 %v768_v37, %v805_v28  ;;  %v771_v54 = vmov 0   ;;  %vm118_vm7 = vc.u32 %v110_v30, %v114_v45 }
  0x24   :  { %vm96_vm6 = vc.u32 %v88_v21, %v92_v36  ;;  %v98_v50 = vadd.s32 %v92_v36, %v88_v21  ;;  %v120_v41 = vadd.s32 %v114_v45, %v110_v30  ;;  %v216_v56 = vshrl.u32 %v769_v39, %v826_v53 }
  0x25   :  { %v97_v55 = vsel %vm96_vm6, 1, %v771_v54  ;;  %v119_v46 = vsel %vm118_vm7, 1, %v771_v54  ;;  %v218_v58 = vshll.u32 %v769_v39, %v805_v28  ;;  %v214_v62 = vor.u32 %v213_v25, %v212_v20 }
  0x26   :  { %v99_v57 = vadd.s32 %v97_v55, %v91_v26  ;;  %vm100_vm8 = vc.u32 %v98_v50, %v94_v40  ;;  %v121_v61 = vadd.s32 %v119_v46, %v113_v43  ;;  %vm122_vm9 = vc.u32 %v120_v41, %v116_v49 }
  0x27   :  { %v101_v60 = vsel %vm100_vm8, 1, %v771_v54  ;;  %v123_v0 = vsel %vm122_vm9, 1, %v771_v54  ;;  %v217_v1 = vor.u32 %v216_v56, %v215_v52  ;;  %v219_v2 = vshrl.u32 %v770_v48, %v826_v53 }
  0x28   :  { %v103_v63 = vadd.s32 %v101_v60, %v99_v57  ;;  %v883_v7 = vadd.s32 %v120_v41, %v116_v49  ;;  %v125_v10 = vadd.s32 %v123_v0, %v121_v61  ;;  %vm221_vm10 = vcmp.lt.s32.totalorder %v835_v59, 1 }
  0x29   :  { %vm223_vm11 = vcmp.lt.s32.totalorder %v835_v59, 3  ;;  %v220_v11 = vor.u32 %v219_v2, %v218_v58  ;;  %vm222_vm12 = vcmp.lt.s32.totalorder %v835_v59, 2  ;;  %vm224_vm13 = vcmp.lt.s32.totalorder %v835_v59, 4 }
  0x2a   :  { %v104_v28 = vadd.s32 %v103_v63, %v93_v38  ;;  %v74_v12 = vsel %vm68_vm5, %v71_v9, %v73_v17  ;;  %v126_v13 = vadd.s32 %v125_v10, %v115_v47  ;;  %v229_v14 = vsel %vm221_vm10, %v863_v18, %v865_v19 }
  0x2b   :  { %v230_v15 = vsel %vm224_vm13, %v217_v1, 920167782  ;;  %v233_v21 = vsel %vm221_vm10, %v865_v19, %v214_v62  ;;  %v238_v27 = vand.u32 65535, %v807_v29  ;;  %v234_v22 = vsel %vm224_vm13, %v220_v11, 1326507024 }
  0x2c   :  { %v897_v16 = vadd.s32 %v104_v28, %v95_v44  ;;  %v231_v20 = vsel %vm223_vm11, %v214_v62, %v230_v15  ;;  %v127_v9 = vadd.s32 %v126_v13, %v117_v51  ;;  %v239_v24 = vshrl.u32 %v807_v29, 16 }
  0x2d   :  { %v232_v17 = vsel %vm222_vm12, %v229_v14, %v231_v20  ;;  %v128_v25 = vmul.u32 %v801_v23, %v74_v12  ;;  %v235_v26 = vsel %vm223_vm11, %v217_v1, %v234_v22  ;;  %v205_v38 = vshrl.u32 %v765_v31, %v826_v53 }
  0x2e   :  { %vm130_vm14 = vc.u32 %v897_v16, %v883_v7  ;;  %v262_v30 = vand.u32 65535, %v232_v17  ;;  %v131_v32 = vadd.s32 1, %v127_v9  ;;  %v236_v34 = vsel %vm222_vm12, %v233_v21, %v235_v26 }
  0x2f   :  { %v263_v36 = vshrl.u32 %v232_v17, 16  ;;  %v240_v40 = vand.u32 65535, %v236_v34  ;;  %v241_v43 = vshrl.u32 %v236_v34, 16  ;;  %v226_v44 = vsel %vm224_vm13, %v214_v62, 2102212464 }
  0x30   :  { %v132_v23 = vsel %vm130_vm14, %v131_v32, %v127_v9  ;;  %v266_v47 = vmul.u32 %v262_v30, %v239_v24  ;;  %v264_v52 = vmul.u32 %v262_v30, %v238_v27  ;;  %v355_v56 = vsel %vm354_vm15, %v815_v42, 0 }
  0x31   :  { %v265_v45 = vmul.u32 %v263_v36, %v238_v27  ;;  %v133_v49 = vadd.s32 %v132_v23, %v128_v25  ;;  %v242_v50 = vmul.u32 %v240_v40, %v238_v27  ;;  %v243_v51 = vmul.u32 %v241_v43, %v238_v27 }
  0x32   :  { %v244_v55 = vmul.u32 %v240_v40, %v239_v24  ;;  %v225_v53 = vsel %vm221_vm10, %v205_v38, %v863_v18  ;;  %v245_v46 = vmul.u32 %v241_v43, %v239_v24  ;;  %v227_v60 = vsel %vm223_vm11, %v865_v19, %v226_v44 }
  0x33   :  { %v268_v41 = vshll.u32 %v265_v45, 16  ;;  %v134_v57 = vadd.s32 536870912, %v133_v49  ;;  %v246_v58 = vshll.u32 %v243_v51, 16  ;;  %v267_v62 = vmul.u32 %v263_v36, %v239_v24 }
  0x34   :  { %v248_v61 = vshll.u32 %v244_v55, 16  ;;  %v270_v63 = vshll.u32 %v266_v47, 16  ;;  %v247_v42 = vshrl.u32 %v243_v51, 16  ;;  %v269_v12 = vshrl.u32 %v265_v45, 16 }
  0x35   :  { %v929_v0 = vshrl.u32 %v134_v57, 30  ;;  %vm250_vm0 = vc.u32 %v242_v50, %v246_v58  ;;  %v252_v1 = vadd.s32 %v246_v58, %v242_v50  ;;  %vm272_vm1 = vc.u32 %v264_v52, %v268_v41 }
  0x36   :  { %v251_v2 = vsel %vm250_vm0, 1, %v771_v54  ;;  %v273_v10 = vsel %vm272_vm1, 1, %v771_v54  ;;  %v274_v18 = vadd.s32 %v268_v41, %v264_v52  ;;  %v357_v14 = vand.u32 31, %v355_v56 }
  0x37   :  { %v136_v28 = vshll.u32 %v929_v0, 30  ;;  %v253_v11 = vadd.s32 %v251_v2, %v245_v46  ;;  %vm254_vm2 = vc.u32 %v252_v1, %v248_v61  ;;  %v275_v13 = vadd.s32 %v273_v10, %v267_v62 }
  0x38   :  { %v255_v19 = vsel %vm254_vm2, 1, %v771_v54  ;;  %vm276_vm3 = vc.u32 %v274_v18, %v270_v63  ;;  %v249_v20 = vshrl.u32 %v244_v55, 16  ;;  %v271_v9 = vshrl.u32 %v266_v47, 16 }
  0x39   :  { %v935_v15 = vsub.s32 %v133_v49, %v136_v28  ;;  %v257_v21 = vadd.s32 %v255_v19, %v253_v11  ;;  %v277_v27 = vsel %vm276_vm3, 1, %v771_v54  ;;  %v940_v25 = vadd.s32 %v274_v18, %v270_v63 }
  0x3a   :  { %v279_v17 = vadd.s32 %v277_v27, %v275_v13  ;;  %v228_v26 = vsel %vm222_vm12, %v225_v53, %v227_v60  ;;  %v944_v32 = vsub.s32 32, %v357_v14  ;;  %v343_v43 = vand.u32 2147483647, %v790_v5 }
  0x3b   :  { %vm138_vm4 = vcmp.lt.s32.totalorder %v935_v15, 0  ;;  %v139_v22 = vsub.s32 0, %v935_v15  ;;  %v258_v24 = vadd.s32 %v257_v21, %v247_v42  ;;  %v282_v23 = vmul.u32 %v807_v29, %v228_v26 }
  0x3c   :  { %v280_v30 = vadd.s32 %v279_v17, %v269_v12  ;;  %v360_v44 = vshll.u32 %v765_v31, %v357_v14  ;;  %v363_v59 = vshll.u32 %v766_v33, %v357_v14  ;;  %v361_v47 = vshrl.u32 %v766_v33, %v944_v32 }
  0x3d   :  { %v140_v34 = vsel %vm138_vm4, %v139_v22, %v935_v15  ;;  %v947_v36 = vadd.s32 %v258_v24, %v249_v20  ;;  %v369_v49 = vshll.u32 %v768_v37, %v357_v14  ;;  %v370_v50 = vshrl.u32 %v769_v39, %v944_v32 }
  0x3e   :  { %v141_v38 = vclz %v140_v34  ;;  %v281_v40 = vadd.s32 %v280_v30, %v271_v9  ;;  %v364_v29 = vshrl.u32 %v767_v35, %v944_v32  ;;  %v366_v52 = vshll.u32 %v767_v35, %v357_v14 }
  0x3f   :  { %vm284_vm5 = vc.u32 %v947_v36, %v940_v25  ;;  %v367_v55 = vshrl.u32 %v768_v37, %v944_v32  ;;  %v965_v57 = vshrl.u32 %v355_v56, 5  ;;  %v350_v46 = vand.u32 8388607, %v343_v43 }
  0x40   :  { %v285_v45 = vadd.s32 1, %v281_v40  ;;  %v689_v51 = vadd.s32 4294967294, %v141_v38  ;;  %v372_v58 = vshll.u32 %v769_v39, %v357_v14  ;;  %v373_v60 = vshrl.u32 %v770_v48, %v944_v32 }
  0x41   :  { %v972_v61 = vor.u32 %v361_v47, %v360_v44  ;;  %v371_v62 = vor.u32 %v370_v50, %v369_v49  ;;  %v974_v1 = vor.u32 %v364_v29, %v363_v59  ;;  %v976_v42 = vor.u32 %v367_v55, %v366_v52 }
  0x42   :  { %v286_v41 = vsel %vm284_vm5, %v285_v45, %v281_v40  ;;  %vm690_vm6 = vcmp.lt.s32.totalorder %v689_v51, 0  ;;  %vm375_vm7 = vcmp.lt.s32.totalorder %v965_v57, 1  ;;  %vm377_vm8 = vcmp.lt.s32.totalorder %v965_v57, 3 }
  0x43   :  { %v287_v53 = vadd.s32 %v286_v41, %v282_v23  ;;  %vm378_vm9 = vcmp.lt.s32.totalorder %v965_v57, 4  ;;  %v351_v2 = vor.u32 8388608, %v350_v46  ;;  %v374_v10 = vor.u32 %v373_v60, %v372_v58 }
  0x44   :  { %v144_v18 = vsel %vm690_vm6, 0, %v689_v51  ;;  %v384_v28 = vsel %vm378_vm9, %v371_v62, 920167782  ;;  %vm376_vm10 = vcmp.lt.s32.totalorder %v965_v57, 2  ;;  %v383_v12 = vsel %vm375_vm7, %v972_v61, %v974_v1 }
  0x45   :  { %v288_v63 = vadd.s32 536870912, %v287_v53  ;;  %v385_v19 = vsel %vm377_vm8, %v976_v42, %v384_v28  ;;  %v387_v13 = vsel %vm375_vm7, %v974_v1, %v976_v42  ;;  %v149_v14 = vsub.s32 4294967266, %v144_v18 }
  0x46   :  { %v388_v21 = vsel %vm378_vm9, %v374_v10, 1326507024  ;;  %v1000_v27 = vshll.u32 %v351_v2, 8  ;;  %v129_v9 = vadd.s32 %v883_v7, %v897_v16  ;;  %v386_v17 = vsel %vm376_vm10, %v383_v12, %v385_v19 }
  0x47   :  { %v981_v56 = vshrl.u32 %v288_v63, 30  ;;  %v389_v22 = vsel %vm377_vm8, %v371_v62, %v388_v21  ;;  %v145_v34 = vsub.s32 32, %v144_v18  ;;  %v150_v44 = vadd.s32 127, %v149_v14  ;;  %v1016_v14 = vld [vmem:[#allocation2 + $0x18] sm:$0xff] }
  0x48   :  { %v390_v26 = vsel %vm376_vm10, %v387_v13, %v389_v22  ;;  %v392_v30 = vand.u32 65535, %v1000_v27  ;;  %v393_v38 = vshrl.u32 %v1000_v27, 16  ;;  %v417_v47 = vshrl.u32 %v386_v17, 16 }
  0x49   :  { %v290_v11 = vshll.u32 %v981_v56, 30  ;;  %v394_v40 = vand.u32 65535, %v390_v26  ;;  %v395_v23 = vshrl.u32 %v390_v26, 16  ;;  %v146_v50 = vshll.u32 %v935_v15, %v144_v18 }
  0x4a   :  { %v147_v51 = vshrl.u32 %v129_v9, %v145_v34  ;;  %v151_v55 = vshll.u32 %v150_v44, 23  ;;  %v283_v46 = vadd.s32 %v940_v25, %v947_v36  ;;  %v419_v58 = vmul.u32 %v417_v47, %v392_v30 }
  0x4b   :  { %v291_v20 = vsub.s32 %v287_v53, %v290_v11  ;;  %v396_v59 = vmul.u32 %v394_v40, %v392_v30  ;;  %v397_v45 = vmul.u32 %v395_v23, %v392_v30  ;;  %v398_v49 = vmul.u32 %v394_v40, %v393_v38 }
  0x4c   :  { %v399_v41 = vmul.u32 %v395_v23, %v393_v38  ;;  %v416_v53 = vand.u32 65535, %v386_v17  ;;  %v148_v10 = vor.u32 %v147_v51, %v146_v50  ;;  %v152_v15 = vor.u32 4788187, %v151_v55 }
  0x4d   :  { %vm292_vm11 = vcmp.lt.s32.totalorder %v291_v20, 0  ;;  %v293_v24 = vsub.s32 0, %v291_v20  ;;  %v400_v52 = vshll.u32 %v397_v45, 16  ;;  %v402_v62 = vshll.u32 %v398_v49, 16 }
  0x4e   :  { %v420_v12 = vmul.u32 %v416_v53, %v393_v38  ;;  %v418_v13 = vmul.u32 %v416_v53, %v392_v30  ;;  %v422_v36 = vshll.u32 %v419_v58, 16  ;;  %v155_v9 = vcvt.s32.f32 %v148_v10 }
  0x4f   :  { %v294_v7 = vsel %vm292_vm11, %v293_v24, %v291_v20  ;;  %vm404_vm13 = vc.u32 %v396_v59, %v400_v52  ;;  %v406_v2 = vadd.s32 %v400_v52, %v396_v59  ;;  %v401_v17 = vshrl.u32 %v397_v45, 16 }
  0x50   :  { %v295_v16 = vclz %v294_v7  ;;  %v405_v63 = vsel %vm404_vm13, 1, %v771_v54  ;;  %v421_v24 = vmul.u32 %v417_v47, %v393_v38  ;;  %v153_v26 = vand.u32 2147483647, %v152_v15 }
  0x51   :  { %v407_v11 = vadd.s32 %v405_v63, %v399_v41  ;;  %vm408_vm14 = vc.u32 %v406_v2, %v402_v62  ;;  %v424_v23 = vshll.u32 %v420_v12, 16  ;;  %v1020_v44 = vmul.f32 0.62831855, %v1016_v14 }
  0x52   :  { %v692_v29 = vadd.s32 4294967294, %v295_v16  ;;  %v409_v22 = vsel %vm408_vm14, 1, %v771_v54  ;;  %v380_v30 = vsel %vm378_vm9, %v976_v42, 2102212464  ;;  %vm426_vm15 = vc.u32 %v418_v13, %v422_v36 }
  0x53   :  { %v411_v40 = vadd.s32 %v409_v22, %v407_v11  ;;  %v427_v59 = vsel %vm426_vm15, 1, %v771_v54  ;;  %v428_v38 = vadd.s32 %v422_v36, %v418_v13  ;;  %v403_v45 = vshrl.u32 %v398_v49, 16 }
  0x54   :  { %vm693_vm12 = vcmp.lt.s32.totalorder %v692_v29, 0  ;;  %v429_v50 = vadd.s32 %v427_v59, %v421_v24  ;;  %v156_v51 = vmul.f32 %v155_v9, %v153_v26  ;;  %v381_v42 = vsel %vm377_vm8, %v974_v1, %v380_v30 }
  0x55   :  { %v298_v60 = vsel %vm693_vm12, 0, %v692_v29  ;;  %v412_v47 = vadd.s32 %v411_v40, %v401_v17  ;;  %v423_v29 = vshrl.u32 %v419_v58, 16  ;;  %vm430_vm0 = vc.u32 %v428_v38, %v424_v23 }
  0x56   :  { %v299_v28 = vsub.s32 32, %v298_v60  ;;  %v303_v18 = vsub.s32 4294967266, %v298_v60  ;;  %v300_v19 = vshll.u32 %v291_v20, %v298_v60  ;;  %v359_v20 = vshrl.u32 %v765_v31, %v944_v32 }
  0x57   :  { %v431_v52 = vsel %vm430_vm0, 1, %v771_v54  ;;  %v500_v55 = vand.u32 2139095040, %v1020_v44  ;;  %v425_v49 = vshrl.u32 %v420_v12, 16  ;;  %v1036_v60 = vadd.s32 %v412_v47, %v403_v45 }
  0x58   :  { %v301_v21 = vshrl.u32 %v283_v46, %v299_v28  ;;  %v304_v25 = vadd.s32 127, %v303_v18  ;;  %v379_v32 = vsel %vm375_vm7, %v359_v20, %v972_v61  ;;  %v433_v46 = vadd.s32 %v431_v52, %v429_v50 }
  0x59   :  { %v1038_v58 = vadd.s32 %v428_v38, %v424_v23  ;;  %v501_v62 = vshrl.u32 %v500_v55, 23  ;;  %v157_v63 = vxor.u32 2147483648, %v156_v51  ;;  %v382_v61 = vsel %vm376_vm10, %v379_v32, %v381_v42 }
  0x5a   :  { %v305_v34 = vshll.u32 %v304_v25, 23  ;;  %v302_v7 = vor.u32 %v301_v21, %v300_v19  ;;  %v434_v2 = vadd.s32 %v433_v46, %v423_v29  ;;  %vm37_vm1 = vcmp.lt.s32.totalorder %v786_v3, 0 }
  0x5b   :  { %v697_v1 = vadd.s32 4294967169, %v501_v62  ;;  %v436_v15 = vmul.u32 %v1000_v27, %v382_v61  ;;  %vm438_vm2 = vc.u32 %v1036_v60, %v1038_v58  ;;  %vm1048_vm3 = vcmp.le.f32.partialorder %v35_v6, 0.7853982 }
  0x5c   :  { %v306_v16 = vor.u32 4788187, %v305_v34  ;;  %v309_v53 = vcvt.s32.f32 %v302_v7  ;;  %v435_v28 = vadd.s32 %v434_v2, %v425_v49  ;;  %v158_v57 = vsel %vm37_vm1, %v157_v63, %v156_v51 }
  0x5d   :  { %v507_v18 = vadd.s32 1, %v697_v1  ;;  %vm191_vm5 = vcmp.lt.s32.totalorder %v788_v4, 0  ;;  %v1058_v21 = vsel %vm1048_vm3, %v786_v3, %v158_v57  ;;  %v497_v6 = vand.u32 2147483647, %v1020_v44 }
  0x5e   :  { %v307_v41 = vand.u32 2147483647, %v306_v16  ;;  %v439_v12 = vadd.s32 1, %v435_v28  ;;  %v1063_v22 = vmul.f32 %v1058_v21, %v1058_v21  ;;  %vm1067_vm6 = vcmp.le.f32.partialorder %v189_v8, 0.7853982 }
  0x5f   :  { %vm508_vm4 = vcmp.gt.s32.totalorder %v507_v18, 0  ;;  %v504_v40 = vand.u32 8388607, %v497_v6  ;;  %vm345_vm13 = vcmp.lt.s32.totalorder %v790_v5, 0 }
  0x60   :  { %v310_v10 = vmul.f32 %v309_v53, %v307_v41  ;;  %v440_v13 = vsel %vm438_vm2, %v439_v12, %v435_v28  ;;  %v509_v27 = vsel %vm508_vm4, %v507_v18, 0  ;;  %v164_v47 = vmul.f32 -0.001358992, %v1063_v22 }
  0x61   :  { %v441_v25 = vadd.s32 %v440_v13, %v436_v15  ;;  %v511_v36 = vand.u32 31, %v509_v27  ;;  %v1089_v45 = vshrl.u32 %v509_v27, 5  ;;  %v505_v29 = vor.u32 8388608, %v504_v40 }
  0x62   :  { %v311_v19 = vxor.u32 2147483648, %v310_v10  ;;  %v1114_v1 = vadd.f32 0.041655596, %v164_v47  ;;  %v437_v13 = vadd.s32 %v1038_v58, %v1036_v60  ;;  %vm1153_vm4 = vcmp.le.f32.partialorder %v343_v43, 0.7853982 }
  0x63   :  { %v442_v9 = vadd.s32 536870912, %v441_v25  ;;  %v512_v17 = vsub.s32 32, %v511_v36  ;;  %v514_v23 = vshll.u32 %v765_v31, %v511_v36  ;;  %v517_v20 = vshll.u32 %v766_v33, %v511_v36 }
  0x64   :  { %v312_v26 = vsel %vm191_vm5, %v311_v19, %v310_v10  ;;  %v523_v8 = vshll.u32 %v768_v37, %v511_v36  ;;  %v520_v50 = vshll.u32 %v767_v35, %v511_v36  ;;  %v526_v32 = vshll.u32 %v769_v39, %v511_v36 }
  0x65   :  { %v1073_v34 = vshrl.u32 %v442_v9, 30  ;;  %v515_v30 = vshrl.u32 %v766_v33, %v512_v17  ;;  %v518_v7 = vshrl.u32 %v767_v35, %v512_v17  ;;  %v524_v16 = vshrl.u32 %v769_v39, %v512_v17 }
  0x66   :  { %v1086_v59 = vsel %vm1067_vm6, %v788_v4, %v312_v26  ;;  %v521_v33 = vshrl.u32 %v768_v37, %v512_v17  ;;  %v527_v42 = vshrl.u32 %v770_v48, %v512_v17  ;;  %vm529_vm8 = vcmp.lt.s32.totalorder %v1089_v45, 1 }
  0x67   :  { %v444_v38 = vshll.u32 %v1073_v34, 30  ;;  %v1098_v52 = vmul.f32 %v1086_v59, %v1086_v59  ;;  %v516_v55 = vor.u32 %v515_v30, %v514_v23  ;;  %v1100_v41 = vor.u32 %v518_v7, %v517_v20 }
  0x68   :  { %v525_v53 = vor.u32 %v524_v16, %v523_v8  ;;  %v528_v46 = vor.u32 %v527_v42, %v526_v32  ;;  %v171_v35 = vmul.f32 -0.00019511016, %v1063_v22  ;;  %v522_v37 = vor.u32 %v521_v33, %v520_v50 }
  0x69   :  { %v445_v51 = vsub.s32 %v441_v25, %v444_v38  ;;  %vm532_vm9 = vcmp.lt.s32.totalorder %v1089_v45, 4  ;;  %v159_v39 = vsub.s32 4, %v929_v0  ;;  %vm531_vm10 = vcmp.lt.s32.totalorder %v1089_v45, 3 }
  0x6a   :  { %v1107_v62 = vshll.u32 %v505_v29, 8  ;;  %v325_v63 = vmul.f32 -0.00019511016, %v1098_v52  ;;  %vm530_vm11 = vcmp.lt.s32.totalorder %v1089_v45, 2  ;;  %v537_v2 = vsel %vm529_vm8, %v516_v55, %v1100_v41 }
  0x6b   :  { %vm446_vm7 = vcmp.lt.s32.totalorder %v445_v51, 0  ;;  %v447_v49 = vsub.s32 0, %v445_v51  ;;  %v538_v10 = vsel %vm532_vm9, %v525_v53, 920167782  ;;  %v542_v28 = vsel %vm532_vm9, %v528_v46, 1326507024 }
  0x6c   :  { %v172_v15 = vadd.f32 0.008332121, %v171_v35  ;;  %v539_v57 = vsel %vm531_vm10, %v522_v37, %v538_v10  ;;  %v541_v12 = vsel %vm529_vm8, %v1100_v41, %v522_v37  ;;  %v318_v19 = vmul.f32 -0.001358992, %v1098_v52 }
  0x6d   :  { %v448_v48 = vsel %vm446_vm7, %v447_v49, %v445_v51  ;;  %v540_v27 = vsel %vm530_vm11, %v537_v2, %v539_v57  ;;  %v543_v25 = vsel %vm531_vm10, %v525_v53, %v542_v28  ;;  %v326_v36 = vadd.f32 0.008332121, %v325_v63 }
  0x6e   :  { %v449_v61 = vclz %v448_v48  ;;  %v546_v9 = vand.u32 65535, %v1107_v62  ;;  %v547_v26 = vshrl.u32 %v1107_v62, 16  ;;  %v513_v23 = vshrl.u32 %v765_v31, %v512_v17 }
  0x6f   :  { %v544_v20 = vsel %vm530_vm11, %v541_v12, %v543_v25  ;;  %v571_v30 = vshrl.u32 %v540_v27, 16  ;;  %v570_v8 = vand.u32 65535, %v540_v27  ;;  %v173_v16 = vmul.f32 %v172_v15, %v1063_v22 }
  0x70   :  { %v695_v18 = vadd.s32 4294967294, %v449_v61  ;;  %v319_v38 = vadd.f32 0.041655596, %v318_v19  ;;  %v548_v47 = vand.u32 65535, %v544_v20  ;;  %v549_v50 = vshrl.u32 %v544_v20, 16 }
  0x71   :  { %v327_v33 = vmul.f32 %v326_v36, %v1098_v52  ;;  %v573_v42 = vmul.u32 %v571_v30, %v546_v9  ;;  %v533_v31 = vsel %vm529_vm8, %v513_v23, %v516_v55  ;;  %v572_v35 = vmul.u32 %v570_v8, %v546_v9 }
  0x72   :  { %vm696_vm12 = vcmp.lt.s32.totalorder %v695_v18, 0  ;;  %v550_v17 = vmul.u32 %v548_v47, %v546_v9  ;;  %v551_v53 = vmul.u32 %v549_v50, %v546_v9  ;;  %v574_v48 = vmul.u32 %v570_v8, %v547_v26 }
  0x73   :  { %v452_v40 = vsel %vm696_vm12, 0, %v695_v18  ;;  %v534_v63 = vsel %vm532_vm9, %v522_v37, 2102212464  ;;  %v553_v61 = vmul.u32 %v549_v50, %v547_v26  ;;  %v575_v18 = vmul.u32 %v571_v30, %v547_v26 }
  0x74   :  { %v453_v60 = vsub.s32 32, %v452_v40  ;;  %v454_v58 = vshll.u32 %v445_v51, %v452_v40  ;;  %v457_v7 = vsub.s32 4294967266, %v452_v40  ;;  %v552_v51 = vmul.u32 %v548_v47, %v547_v26 }
  0x75   :  { %v554_v2 = vshll.u32 %v551_v53, 16  ;;  %v576_v57 = vshll.u32 %v573_v42, 16  ;;  %v555_v12 = vshrl.u32 %v551_v53, 16  ;;  %v578_v19 = vshll.u32 %v574_v48, 16 }
  0x76   :  { %v455_v29 = vshrl.u32 %v437_v13, %v453_v60  ;;  %v458_v32 = vadd.s32 127, %v457_v7  ;;  %v556_v10 = vshll.u32 %v552_v51, 16  ;;  %v577_v9 = vshrl.u32 %v573_v42, 16 }
  0x77   :  { %vm558_vm14 = vc.u32 %v550_v17, %v554_v2  ;;  %v560_v55 = vadd.s32 %v554_v2, %v550_v17  ;;  %vm580_vm15 = vc.u32 %v572_v35, %v576_v57  ;;  %v582_v25 = vadd.s32 %v576_v57, %v572_v35 }
  0x78   :  { %v456_v49 = vor.u32 %v455_v29, %v454_v58  ;;  %v459_v46 = vshll.u32 %v458_v32, 23  ;;  %v559_v27 = vsel %vm558_vm14, 1, %v771_v54  ;;  %v581_v37 = vsel %vm580_vm15, 1, %v771_v54 }
  0x79   :  { %v561_v36 = vadd.s32 %v559_v27, %v553_v61  ;;  %vm562_vm0 = vc.u32 %v560_v55, %v556_v10  ;;  %v583_v20 = vadd.s32 %v581_v37, %v575_v18  ;;  %vm584_vm2 = vc.u32 %v582_v25, %v578_v19 }
  0x7a   :  { %v460_v28 = vor.u32 4788187, %v459_v46  ;;  %v463_v15 = vcvt.s32.f32 %v456_v49  ;;  %v563_v23 = vsel %vm562_vm0, 1, %v771_v54  ;;  %v535_v26 = vsel %vm531_vm10, %v1100_v41, %v534_v63 }
  0x7b   :  { %v557_v30 = vshrl.u32 %v552_v51, 16  ;;  %v565_v60 = vadd.s32 %v563_v23, %v561_v36  ;;  %v585_v58 = vsel %vm584_vm2, 1, %v771_v54  ;;  %v579_v47 = vshrl.u32 %v574_v48, 16 }
  0x7c   :  { %v461_v13 = vand.u32 2147483647, %v460_v28  ;;  %v587_v50 = vadd.s32 %v585_v58, %v583_v20  ;;  %v166_v29 = vmul.f32 %v1114_v1, %v1063_v22  ;;  %v1159_v42 = vadd.s32 %v582_v25, %v578_v19 }
  0x7d   :  { %v566_v32 = vadd.s32 %v565_v60, %v555_v12  ;;  %v174_v41 = vadd.f32 -0.16666654, %v173_v16  ;;  %v536_v54 = vsel %vm530_vm11, %v533_v31, %v535_v26  ;;  %v320_v53 = vmul.f32 %v319_v38, %v1098_v52 }
  0x7e   :  { %v464_v40 = vmul.f32 %v463_v15, %v461_v13  ;;  %v588_v43 = vadd.s32 %v587_v50, %v577_v9  ;;  %v328_v51 = vadd.f32 -0.16666654, %v327_v33  ;;  %v160_v1 = vsel %vm37_vm1, %v159_v39, %v929_v0 }
  0x7f   :  { %v1169_v46 = vadd.s32 %v566_v32, %v557_v30  ;;  %v167_v45 = vadd.f32 -0.4999988, %v166_v29  ;;  %v313_v31 = vsub.s32 4, %v981_v56  ;;  %v590_v38 = vmul.u32 %v1107_v62, %v536_v54 }
  0x80   :  { %v465_v8 = vxor.u32 2147483648, %v464_v40  ;;  %v589_v35 = vadd.s32 %v588_v43, %v579_v47  ;;  %v175_v33 = vmul.f32 %v174_v41, %v1063_v22  ;;  %v321_v2 = vadd.f32 -0.4999988, %v320_v53 }
  0x81   :  { %vm592_vm7 = vc.u32 %v1169_v46, %v1159_v42  ;;  %v329_v10 = vmul.f32 %v328_v51, %v1098_v52  ;;  %v467_v0 = vsub.s32 4, %v1073_v34  ;;  %v162_v18 = vsel %vm1048_vm3, 0, %v160_v1 }
  0x82   :  { %v466_v17 = vsel %vm345_vm13, %v465_v8, %v464_v40  ;;  %v593_v61 = vadd.s32 1, %v589_v35  ;;  %v168_v62 = vmul.f32 %v167_v45, %v1063_v22  ;;  %v176_v12 = vadd.f32 1.0, %v175_v33 }
  0x83   :  { %v469_v49 = vsel %vm1153_vm4, %v790_v5, %v466_v17  ;;  %v314_v55 = vsel %vm191_vm5, %v313_v31, %v981_v56  ;;  %v322_v27 = vmul.f32 %v321_v2, %v1098_v52  ;;  %v330_v25 = vadd.f32 1.0, %v329_v10 }
  0x84   :  { %v471_v16 = vmul.f32 %v469_v49, %v469_v49  ;;  %v594_v15 = vsel %vm592_vm7, %v593_v61, %v589_v35  ;;  %v468_v36 = vsel %vm345_vm13, %v467_v0, %v1073_v34  ;;  %v169_v40 = vadd.f32 1.0, %v168_v62 }
  0x85   :  { %v595_v57 = vadd.s32 %v594_v15, %v590_v38  ;;  %v179_v22 = vand.u32 3, %v162_v18  ;;  %v316_v23 = vsel %vm1067_vm6, 0, %v314_v55  ;;  %v177_v56 = vmul.f32 %v176_v12, %v1058_v21 }
  0x86   :  { %v472_v48 = vmul.f32 -0.001358992, %v471_v16  ;;  %v479_v63 = vmul.f32 -0.00019511016, %v471_v16  ;;  %v470_v52 = vsel %vm1153_vm4, 0, %v468_v36  ;;  %v323_v60 = vadd.f32 1.0, %v322_v27 }
  0x87   :  { %v596_v9 = vadd.s32 536870912, %v595_v57  ;;  %v331_v34 = vmul.f32 %v330_v25, %v1086_v59  ;;  %v333_v8 = vand.u32 3, %v316_v23  ;;  %vm181_vm1 = vcmp.eq.s32.totalorder %v179_v22, 0  ;;  %v709_v25 = vld [vmem:[#allocation2] sm:$0xff]  ;;  %v710_v36 = vld [vmem:[#allocation2 + $0x8] sm:$0xff] }
  0x88   :  { %v473_v39 = vadd.f32 0.041655596, %v472_v48  ;;  %v480_v28 = vadd.f32 0.008332121, %v479_v63  ;;  %v487_v24 = vand.u32 3, %v470_v52  ;;  %v182_v32 = vxor.u32 2147483648, %v177_v56 }
  0x89   :  { %v1195_v20 = vshrl.u32 %v596_v9, 30  ;;  %vm184_vm3 = vcmp.eq.s32.totalorder %v179_v22, 2  ;;  %v185_v41 = vxor.u32 2147483648, %v169_v40  ;;  %v336_v17 = vxor.u32 2147483648, %v331_v34  ;;  %v711_v9 = vld [vmem:[#allocation2 + $0x10] sm:$0xff] }
  0x8a   :  { %v474_v19 = vmul.f32 %v473_v39, %v471_v16  ;;  %v481_v13 = vmul.f32 %v480_v28, %v471_v16  ;;  %v339_v7 = vxor.u32 2147483648, %v323_v60  ;;  %vm335_vm6 = vcmp.eq.s32.totalorder %v333_v8, 0 }
  0x8b   :  { %v598_v58 = vshll.u32 %v1195_v20, 30  ;;  %vm338_vm8 = vcmp.eq.s32.totalorder %v333_v8, 2  ;;  %vm489_vm9 = vcmp.eq.s32.totalorder %v487_v24, 0  ;;  %vm492_vm10 = vcmp.eq.s32.totalorder %v487_v24, 2 }
  0x8c   :  { %v475_v11 = vadd.f32 -0.4999988, %v474_v19  ;;  %v482_v37 = vadd.f32 -0.16666654, %v481_v13  ;;  %vm180_vm11 = vcmp.lt.s32.totalorder %v179_v22, 2  ;;  %vm334_vm12 = vcmp.lt.s32.totalorder %v333_v8, 2 }
  0x8d   :  { %v599_v29 = vsub.s32 %v595_v57, %v598_v58  ;;  %v183_v1 = vsel %vm181_vm1, %v169_v40, %v182_v32  ;;  %v337_v35 = vsel %vm335_vm6, %v323_v60, %v336_v17  ;;  %vm488_vm13 = vcmp.lt.s32.totalorder %v487_v24, 2 }
  0x8e   :  { %v476_v26 = vmul.f32 %v475_v11, %v471_v16  ;;  %v483_v30 = vmul.f32 %v482_v37, %v471_v16  ;;  %v186_v16 = vsel %vm184_vm3, %v185_v41, %v177_v56  ;;  %vm178_vm14 = vweird.f32 %v786_v3 }
  0x8f   :  { %vm600_vm5 = vcmp.lt.s32.totalorder %v599_v29, 0  ;;  %v601_v54 = vsub.s32 0, %v599_v29  ;;  %vm332_vm15 = vweird.f32 %v788_v4  ;;  %v187_v33 = vsel %vm180_vm11, %v183_v1, %v186_v16 }
  0x90   :  { %v477_v47 = vadd.f32 1.0, %v476_v26  ;;  %v484_v50 = vadd.f32 1.0, %v483_v30  ;;  %v591_v63 = vadd.s32 %v1159_v42, %v1169_v46  ;;  %vm486_vm2 = vweird.f32 %v790_v5 }
  0x91   :  { %v602_v53 = vsel %vm600_vm5, %v601_v54, %v599_v29  ;;  %v188_v28 = vsel %vm178_vm14, nan, %v187_v33  ;;  %vm659_vm4 = vcmp.lt.f32.partialorder %v709_v25, 5.0  ;;  %vm660_vm7 = vcmp.lt.f32.partialorder %v710_v36, 5.0 }
  0x92   :  { %v485_v21 = vmul.f32 %v484_v50, %v469_v49  ;;  %v493_v59 = vxor.u32 2147483648, %v477_v47  ;;  %v603_v51 = vclz %v602_v53  ;;  %v340_v49 = vsel %vm338_vm8, %v339_v7, %v331_v34 }
  0x93   :  { %v341_v48 = vsel %vm334_vm12, %v337_v35, %v340_v49  ;;  %v651_v12 = vmul.f32 0.5, %v188_v28  ;;  %vm661_vm1 = vcmp.lt.f32.partialorder %v711_v9, 5.0  ;;  %vm499_vm3 = vcmp.lt.s32.totalorder %v1020_v44, 0 }
  0x94   :  { %v490_v43 = vxor.u32 2147483648, %v485_v21  ;;  %v494_v31 = vsel %vm492_vm10, %v493_v59, %v485_v21  ;;  %v698_v38 = vadd.s32 4294967294, %v603_v51  ;;  %v342_v15 = vsel %vm332_vm15, nan, %v341_v48 }
  0x95   :  { %v652_v55 = vmul.f32 0.5, %v342_v15  ;;  %v655_v46 = vadd.f32 0.5, %v651_v12  ;;  %vm1212_vm5 = vcmp.le.f32.partialorder %v497_v6, 0.7853982  ;;  %v621_v30 = vsub.s32 4, %v1195_v20 }
  0x96   :  { %v491_v45 = vsel %vm489_vm9, %v477_v47, %v490_v43  ;;  %vm699_vm0 = vcmp.lt.s32.totalorder %v698_v38, 0  ;;  %vm640_vm10 = vweird.f32 %v1020_v44  ;;  %vm662_vm11 = vcmp.lt.f32.partialorder %v1016_v14, 5.0 }
  0x97   :  { %v495_v61 = vsel %vm488_vm13, %v491_v45, %v494_v31  ;;  %v606_v2 = vsel %vm699_vm0, 0, %v698_v38  ;;  %v656_v27 = vadd.f32 0.5, %v652_v55  ;;  %v663_v37 = vsel %vm659_vm4, %v655_v46, 0.0 }
  0x98   :  { %v607_v10 = vsub.s32 32, %v606_v2  ;;  %v608_v0 = vshll.u32 %v599_v29, %v606_v2  ;;  %v611_v39 = vsub.s32 4294967266, %v606_v2  ;;  %v496_v18 = vsel %vm486_vm2, nan, %v495_v61  ;;  %667 = vst [vmem:[#allocation5] sm:$0xff] %v663_v37 }
  0x99   :  { %v653_v19 = vmul.f32 0.5, %v496_v18  ;;  %v664_v40 = vsel %vm660_vm7, %v656_v27, 0.0  ;;  %v622_v47 = vsel %vm499_vm3, %v621_v30, %v1195_v20 }
  0x9a   :  { %v609_v62 = vshrl.u32 %v591_v63, %v607_v10  ;;  %v612_v3 = vadd.s32 127, %v611_v39  ;;  %668 = vst [vmem:[#allocation5 + $0x8] sm:$0xff] %v664_v40  ;;  %v624_v6 = vsel %vm1212_vm5, 0, %v622_v47 }
  0x9b   :  { %v657_v5 = vadd.f32 0.5, %v653_v19  ;;  %v641_v17 = vand.u32 3, %v624_v6 }
  0x9c   :  { %v610_v57 = vor.u32 %v609_v62, %v608_v0  ;;  %v613_v4 = vshll.u32 %v612_v3, 23 }
  0x9d   :  { %v665_v22 = vsel %vm661_vm1, %v657_v5, 0.0  ;;  %vm646_vm6 = vcmp.eq.s32.totalorder %v641_v17, 2  ;;  %vm643_vm8 = vcmp.eq.s32.totalorder %v641_v17, 0  ;;  %vm642_vm9 = vcmp.lt.s32.totalorder %v641_v17, 2 }
  0x9e   :  { %v614_v13 = vor.u32 4788187, %v613_v4  ;;  %v617_v42 = vcvt.s32.f32 %v610_v57  ;;  %669 = vst [vmem:[#allocation5 + $0x10] sm:$0xff] %v665_v22 }
  0xa0   :  { %v615_v11 = vand.u32 2147483647, %v614_v13 }
  0xa2   :  { %v618_v23 = vmul.f32 %v617_v42, %v615_v11 }
  0xa4   :  { %v619_v52 = vxor.u32 2147483648, %v618_v23 }
  0xa6   :  { %v620_v26 = vsel %vm499_vm3, %v619_v52, %v618_v23 }
  0xa7   :  { %v623_v60 = vsel %vm1212_vm5, %v1020_v44, %v620_v26 }
  0xa8   :  { %v625_v34 = vmul.f32 %v623_v60, %v623_v60 }
  0xaa   :  { %v626_v58 = vmul.f32 -0.001358992, %v625_v34  ;;  %v633_v8 = vmul.f32 -0.00019511016, %v625_v34 }
  0xac   :  { %v627_v50 = vadd.f32 0.041655596, %v626_v58  ;;  %v634_v24 = vadd.f32 0.008332121, %v633_v8 }
  0xae   :  { %v628_v29 = vmul.f32 %v627_v50, %v625_v34  ;;  %v635_v32 = vmul.f32 %v634_v24, %v625_v34 }
  0xb0   :  { %v629_v41 = vadd.f32 -0.4999988, %v628_v29  ;;  %v636_v21 = vadd.f32 -0.16666654, %v635_v32 }
  0xb2   :  { %v630_v7 = vmul.f32 %v629_v41, %v625_v34  ;;  %v637_v54 = vmul.f32 %v636_v21, %v625_v34 }
  0xb4   :  { %v631_v43 = vadd.f32 1.0, %v630_v7  ;;  %v638_v59 = vadd.f32 1.0, %v637_v54 }
  0xb6   :  { %v639_v53 = vmul.f32 %v638_v59, %v623_v60  ;;  %v647_v51 = vxor.u32 2147483648, %v631_v43 }
  0xb8   :  { %v644_v20 = vxor.u32 2147483648, %v639_v53  ;;  %v648_v1 = vsel %vm646_vm6, %v647_v51, %v639_v53 }
  0xba   :  { %v645_v16 = vsel %vm643_vm8, %v631_v43, %v644_v20 }
  0xbb   :  { %v649_v35 = vsel %vm642_vm9, %v645_v16, %v648_v1 }
  0xbc   :  { %v650_v49 = vsel %vm640_vm10, nan, %v649_v35 }
  0xbd   :  { %v654_v45 = vmul.f32 0.5, %v650_v49 }
  0xbf   :  { %v658_v31 = vadd.f32 0.5, %v654_v45 }
  0xc1   :  { %v666_v38 = vsel %vm662_vm11, %v658_v31, 0.0 }
  0xc2   :  { %670 = vst [vmem:[#allocation5 + $0x18] sm:$0xff] %v666_v38 }
  0xc3   :  { %681 = dma.vmem_to_hbm [thread:$0]  %s677_s11, 512, %s679_s14, [#allocation4]  }
  0xc4   :  { %762 = dma.done.wait [#allocation4], 512  }
  0xc5   :  { %763 = vsyncadd [#allocation4], 4294966784 }
  0xc6   :  { %686 = vsyncpa [#allocation3], 1 }
  0xc7   :  { %687 = vsyncpa [#allocation4], 1 }

</bundles_post_ra>
